<compile_context>
chip_gen: v5e
topology: v5e:2x2
jax: 0.10.0
libtpu: 0.0.40
codegen_flags: <defaults>
</compile_context>

<pallas_src>
import functools

import jax
import jax.numpy as jnp
from jax.experimental import pallas as pl
from jax.experimental.pallas import tpu as pltpu


def _infonce_lse_kernel(cols_ref, rows_t_ref, out_ref, s_sc, *,
                        inv_tau: float, tm: int, tn: int):
    """One (TN keys) x (TM queries) tile of the logsumexp sweep.

    cols_ref   : (TN, E) bf16  normalized rows of concat(z1, z2)     (streamed)
    rows_t_ref : (E, TM) bf16  normalized rows, transposed, * 1/tau  (row-resident)
    out_ref    : (1, 1, TM) f32  per-query  logsumexp_{j != i} sim[i, j]
    s_sc       : (1, TM) f32     running  sum_j exp(sim[i, j] - 1/tau)
    """
    r = pl.program_id(0)
    c = pl.program_id(1)
    n_c = pl.num_programs(1)
    inv_tau_f = jnp.float32(inv_tau)

    @pl.when(c == 0)
    def _init():
        s_sc[...] = jnp.zeros_like(s_sc)

    # Single MXU-canonical matmul: (TN, E) @ (E, TM) -> (TN, TM) f32.
    # Keys on sublanes, queries on lanes; 1/tau is already folded into rows_t.
    sim = jnp.dot(cols_ref[...], rows_t_ref[...],
                  preferred_element_type=jnp.float32)

    # Static max: sim = cos/tau <= 1/tau, so exp(sim - 1/tau) lies in (0, 1].
    # No online max / rescale needed (safe in f32 for any reasonable tau).
    e = jnp.exp(sim - inv_tau_f)

    # Self-similarity exclusion.  Global key = c*TN + k (sublane), global
    # query = r*TM + q (lane); the main diagonal hits this tile iff
    # k == q + d has a solution, with d = r*TM - c*TN.
    d = r * tm - c * tn
    has_diag = jnp.logical_and(d > -tm, d < tn)

    @pl.when(jnp.logical_not(has_diag))
    def _accum_off_diag():
        s_sc[...] += jnp.sum(e, axis=0, keepdims=True)

    @pl.when(has_diag)
    def _accum_on_diag():
        k_sub = jax.lax.broadcasted_iota(jnp.int32, (tn, tm), 0)
        q_lan = jax.lax.broadcasted_iota(jnp.int32, (tn, tm), 1)
        e_masked = jnp.where(k_sub == q_lan + d, jnp.float32(0.0), e)
        s_sc[...] += jnp.sum(e_masked, axis=0, keepdims=True)

    @pl.when(c == n_c - 1)
    def _finalize():
        lse = inv_tau_f + jnp.log(s_sc[...])            # (1, TM), lane-dense
        out_ref[...] = lse.reshape(out_ref.shape)


def _pick_tiles(two_n: int, embed: int) -> tuple[int, int]:
    """(row tile TM, column tile TN) for the 2N x 2N similarity sweep."""
    budget = 8 << 20   # per-stream double-buffered bf16 bytes (fits v7x 64 MiB VMEM)
    # Row (query) tile: lane dim of the (E, TM) operand and of the sim tile.
    # Must be a multiple of 128 dividing 2N, or the full 2N.  Prefer >= 2 row
    # blocks so the "parallel" axis can shard across both TensorCores (v7x),
    # and as large as the budget allows to cut HBM re-streaming of columns.
    tm = two_n
    if two_n % 128 == 0:
        for t in (512, 256, 128):
            if two_n % t == 0 and two_n // t >= 2 and 4 * embed * t <= budget:
                tm = t
                break
    # Column (key) tile: sublane dim of the streamed (TN, E) block.  Multiple
    # of 8 dividing 2N (or full).  Bigger -> fewer grid steps.
    tn = two_n
    if two_n % 8 == 0:
        for t in (1024, 512, 256, 128, 64, 32, 16, 8):
            if t <= two_n and two_n % t == 0 and 4 * embed * t <= budget:
                tn = t
                break
    return tm, tn


def infonce_loss(z1: jax.Array, z2: jax.Array, tau: float = 0.5,
                 block_rows: int | None = None,
                 block_cols: int | None = None) -> jax.Array:
    """InfoNCE loss matching the PyTorch module. z1, z2: (set_size, embed)."""
    assert z1.shape == z2.shape and z1.ndim == 2
    n, e = z1.shape
    two_n = 2 * n
    inv_tau = 1.0 / float(tau)
    eps_sq = jnp.float32(1e-16)   # clamp on ||x||^2 (torch CosineSimilarity eps=1e-8)

    # ---- O(N*E) prepass (wrapper): normalize, positives, bf16 casts. ----
    z1f = z1.astype(jnp.float32)
    z2f = z2.astype(jnp.float32)
    z1n = z1f * jax.lax.rsqrt(jnp.maximum(jnp.sum(z1f * z1f, -1, keepdims=True), eps_sq))
    z2n = z2f * jax.lax.rsqrt(jnp.maximum(jnp.sum(z2f * z2f, -1, keepdims=True), eps_sq))
    # Positive logit cos(z1_i, z2_i)/tau is identical for rows i and i+N; only
    # its mean enters the loss, so keep it in f32 outside the kernel.
    pos_mean = jnp.mean(jnp.sum(z1n * z2n, -1)) * jnp.float32(inv_tau)

    p = jnp.concatenate([z1n, z2n], axis=0)                        # (2N, E) f32
    cols = p.astype(jnp.bfloat16)                                  # streamed key blocks
    rows_t = (p * jnp.float32(inv_tau)).T.astype(jnp.bfloat16)     # (E, 2N), 1/tau folded

    # ---- Tiling. ----
    tm, tn = _pick_tiles(two_n, e)
    if block_rows is not None:
        tm = block_rows
    if block_cols is not None:
        tn = block_cols
    # TODO(synk): pad + mask the key axis so 2N values with no valid divisor
    # don't fall back to a single full-size block.
    assert two_n % tm == 0 and (tm == two_n or tm % 128 == 0), (two_n, tm)
    assert two_n % tn == 0 and (tn == two_n or tn % 8 == 0), (two_n, tn)
    grid = (two_n // tm, two_n // tn)     # (row blocks: parallel, col blocks: reduction)
    # TODO(synk): tile the embed (K) axis with an inner "arbitrary" grid axis and
    # an f32 sim accumulator for very large embed dims (bounds VMEM on v7x).

    kernel = functools.partial(_infonce_lse_kernel, inv_tau=inv_tau, tm=tm, tn=tn)
    lse_blocks = pl.pallas_call(
        kernel,
        out_shape=jax.ShapeDtypeStruct((grid[0], 1, tm), jnp.float32),
        grid_spec=pltpu.PrefetchScalarGridSpec(
            num_scalar_prefetch=0,
            grid=grid,
            in_specs=[
                pl.BlockSpec((tn, e), lambda r, c: (c, 0)),   # key blocks (fast-varying)
                pl.BlockSpec((e, tm), lambda r, c: (0, r)),   # query block (row-resident)
            ],
            out_specs=pl.BlockSpec((1, 1, tm), lambda r, c: (r, 0, 0)),
            scratch_shapes=[pltpu.VMEM((1, tm), jnp.float32)]),   # running sum s
        compiler_params=pltpu.CompilerParams(
            dimension_semantics=("parallel", "arbitrary"),
            vmem_limit_bytes=64 * 1024 * 1024),
    )(cols, rows_t)

    lse = lse_blocks.reshape(two_n)       # per-row logsumexp_{j != i} sim[i, j]
    return jnp.mean(lse) - pos_mean


def _infonce_reference(z1, z2, tau=0.5):
    """Pure-JAX f32 reference mirroring the PyTorch forward."""
    p = jnp.concatenate([z1, z2], axis=0).astype(jnp.float32)
    n = z1.shape[0]
    two_n = 2 * n
    norm = jnp.maximum(jnp.linalg.norm(p, axis=-1, keepdims=True), 1e-8)
    pn = p / norm
    sim = (pn @ pn.T) / tau
    idx = jnp.arange(two_n)
    pos = sim[idx, (idx + n) % two_n]
    sim_m = jnp.where(jnp.eye(two_n, dtype=bool), -jnp.inf, sim)
    lse = jax.scipy.special.logsumexp(sim_m, axis=-1)
    return jnp.sum(lse - pos) / two_n


if __name__ == "__main__":
    tau = 0.5
    key = jax.random.PRNGKey(0)
    k1, k2, k3, k4 = jax.random.split(key, 4)

    # Small shapes consistent with the module: (set_size, embed) = (8, 32).
    # block_cols=8 -> grid (1, 2): exercises the running-sum accumulation.
    z1 = jax.random.normal(k1, (8, 32), dtype=jnp.float32)
    z2 = jax.random.normal(k2, (8, 32), dtype=jnp.float32)
    loss = jax.block_until_ready(infonce_loss(z1, z2, tau=tau, block_cols=8))
    ref = jax.block_until_ready(_infonce_reference(z1, z2, tau=tau))
    assert jnp.allclose(loss, ref, atol=3e-2, rtol=3e-2), (loss, ref)

    # Multi-block path: 2 row blocks x 4 column blocks exercises the parallel
    # row axis, the running sum and the diagonal-tile gating.
    z1b = jax.random.normal(k3, (128, 64), dtype=jnp.float32)
    z2b = jax.random.normal(k4, (128, 64), dtype=jnp.float32)
    loss_b = jax.block_until_ready(
        infonce_loss(z1b, z2b, tau=tau, block_rows=128, block_cols=64))
    ref_b = jax.block_until_ready(_infonce_reference(z1b, z2b, tau=tau))
    assert jnp.allclose(loss_b, ref_b, atol=3e-2, rtol=3e-2), (loss_b, ref_b)

    print("KERNEL_OK")
</pallas_src>

<mosaic_0001>
module attributes {stable_mosaic.version = 11 : i64} {
  func.func @_infonce_lse_kernel(%arg0: i32, %arg1: i32, %arg2: memref<8x32xbf16, #tpu.memory_space<vmem>>, %arg3: memref<32x16xbf16, #tpu.memory_space<vmem>>, %arg4: memref<1x1x16xf32, #tpu.memory_space<vmem>>, %arg5: memref<1x16xf32, #tpu.memory_space<vmem>>) attributes {dimension_semantics = [#tpu.dimension_semantics<parallel>, #tpu.dimension_semantics<arbitrary>], iteration_bounds = array<i64: 1, 2>, scalar_prefetch = 0 : i64, scratch_operands = 1 : i64, tpu.core_type = #tpu.core_type<tc>, window_params = [{transform_indices = @transform_0, window_bounds = array<i64: 8, 32>}, {transform_indices = @transform_1, window_bounds = array<i64: 32, 16>}, {transform_indices = @transform_2, window_bounds = array<i64: 1, 1, 16>}]} {
    %c0_i32 = arith.constant 0 : i32
    %0 = arith.cmpi eq, %arg1, %c0_i32 : i32
    %1 = arith.extui %0 : i1 to i32
    %c0_i32_0 = arith.constant 0 : i32
    %2 = arith.cmpi ne, %1, %c0_i32_0 : i32
    scf.if %2 {
      %cst_10 = arith.constant 0.000000e+00 : f32
      %23 = vector.broadcast %cst_10 : f32 to vector<1x16xf32>
      %c0_11 = arith.constant 0 : index
      %c0_12 = arith.constant 0 : index
      %24 = vector.load %arg5[%c0_11, %c0_12] : memref<1x16xf32, #tpu.memory_space<vmem>>, vector<1x16xf32>
      tpu.vector_store %arg5[%c0_11, %c0_12], %23 {strides = array<i32>} : memref<1x16xf32, #tpu.memory_space<vmem>>, vector<1x16xf32>,
    } else {
    }
    %c0 = arith.constant 0 : index
    %c0_1 = arith.constant 0 : index
    %3 = vector.load %arg2[%c0, %c0_1] : memref<8x32xbf16, #tpu.memory_space<vmem>>, vector<8x32xbf16>
    %c0_2 = arith.constant 0 : index
    %c0_3 = arith.constant 0 : index
    %4 = vector.load %arg3[%c0_2, %c0_3] : memref<32x16xbf16, #tpu.memory_space<vmem>>, vector<32x16xbf16>
    %cst = arith.constant dense<0.000000e+00> : vector<8x16xf32>
    %5 = tpu.matmul %3, %4, %cst {dimension_numbers = #tpu.dot_dimension_numbers<[1], [0], [0], [1], [0, 0, 1, 1], [], []>} : vector<8x32xbf16>, vector<32x16xbf16>, vector<8x16xf32> -> vector<8x16xf32>
    %cst_4 = arith.constant 2.000000e+00 : f32
    %6 = vector.broadcast %cst_4 : f32 to vector<8x16xf32>
    %7 = arith.subf %5, %6 : vector<8x16xf32>
    %8 = math.exp %7 : vector<8x16xf32>
    %c16_i32 = arith.constant 16 : i32
    %9 = arith.muli %arg0, %c16_i32 : i32
    %c8_i32 = arith.constant 8 : i32
    %10 = arith.muli %arg1, %c8_i32 : i32
    %11 = arith.subi %9, %10 : i32
    %c-16_i32 = arith.constant -16 : i32
    %12 = arith.cmpi sgt, %11, %c-16_i32 : i32
    %c8_i32_5 = arith.constant 8 : i32
    %13 = arith.cmpi slt, %11, %c8_i32_5 : i32
    %14 = arith.andi %12, %13 : i1
    %true = arith.constant true
    %15 = arith.xori %14, %true : i1
    %16 = arith.extui %15 : i1 to i32
    %c0_i32_6 = arith.constant 0 : i32
    %17 = arith.cmpi ne, %16, %c0_i32_6 : i32
    scf.if %17 {
      %c0_10 = arith.constant 0 : index
      %c0_11 = arith.constant 0 : index
      %23 = vector.load %arg5[%c0_10, %c0_11] : memref<1x16xf32, #tpu.memory_space<vmem>>, vector<1x16xf32>
      %cst_12 = arith.constant dense<0.000000e+00> : vector<16xf32>
      %24 = vector.multi_reduction <add>, %8, %cst_12 [0] : vector<8x16xf32> to vector<16xf32>
      %25 = vector.shape_cast %24 : vector<16xf32> to vector<1x16xf32>
      %26 = arith.addf %23, %25 : vector<1x16xf32>
      %c0_13 = arith.constant 0 : index
      %c0_14 = arith.constant 0 : index
      %27 = vector.load %arg5[%c0_13, %c0_14] : memref<1x16xf32, #tpu.memory_space<vmem>>, vector<1x16xf32>
      tpu.vector_store %arg5[%c0_13, %c0_14], %26 {strides = array<i32>} : memref<1x16xf32, #tpu.memory_space<vmem>>, vector<1x16xf32>,
    } else {
    }
    %18 = arith.extui %14 : i1 to i32
    %c0_i32_7 = arith.constant 0 : i32
    %19 = arith.cmpi ne, %18, %c0_i32_7 : i32
    scf.if %19 {
      %23 = tpu.iota {dimensions = array<i32: 0>} : vector<8x16xi32>
      %24 = tpu.iota {dimensions = array<i32: 1>} : vector<8x16xi32>
      %25 = vector.broadcast %11 : i32 to vector<8x16xi32>
      %26 = arith.addi %24, %25 : vector<8x16xi32>
      %27 = arith.cmpi eq, %23, %26 : vector<8x16xi32>
      %cst_10 = arith.constant 0.000000e+00 : f32
      %28 = vector.broadcast %cst_10 : f32 to vector<8x16xf32>
      %29 = arith.select %27, %28, %8 : vector<8x16xi1>, vector<8x16xf32>
      %c0_11 = arith.constant 0 : index
      %c0_12 = arith.constant 0 : index
      %30 = vector.load %arg5[%c0_11, %c0_12] : memref<1x16xf32, #tpu.memory_space<vmem>>, vector<1x16xf32>
      %cst_13 = arith.constant dense<0.000000e+00> : vector<16xf32>
      %31 = vector.multi_reduction <add>, %29, %cst_13 [0] : vector<8x16xf32> to vector<16xf32>
      %32 = vector.shape_cast %31 : vector<16xf32> to vector<1x16xf32>
      %33 = arith.addf %30, %32 : vector<1x16xf32>
      %c0_14 = arith.constant 0 : index
      %c0_15 = arith.constant 0 : index
      %34 = vector.load %arg5[%c0_14, %c0_15] : memref<1x16xf32, #tpu.memory_space<vmem>>, vector<1x16xf32>
      tpu.vector_store %arg5[%c0_14, %c0_15], %33 {strides = array<i32>} : memref<1x16xf32, #tpu.memory_space<vmem>>, vector<1x16xf32>,
    } else {
    }
    %c1_i32 = arith.constant 1 : i32
    %20 = arith.cmpi eq, %arg1, %c1_i32 : i32
    %21 = arith.extui %20 : i1 to i32
    %cst_8 = arith.constant 2.000000e+00 : f32
    %c0_i32_9 = arith.constant 0 : i32
    %22 = arith.cmpi ne, %21, %c0_i32_9 : i32
    scf.if %22 {
      %c0_10 = arith.constant 0 : index
      %c0_11 = arith.constant 0 : index
      %23 = vector.load %arg5[%c0_10, %c0_11] : memref<1x16xf32, #tpu.memory_space<vmem>>, vector<1x16xf32>
      %24 = math.log %23 : vector<1x16xf32>
      %25 = vector.broadcast %cst_8 : f32 to vector<1x16xf32>
      %26 = arith.addf %25, %24 : vector<1x16xf32>
      %27 = vector.shape_cast %26 : vector<1x16xf32> to vector<1x1x16xf32>
      %c0_12 = arith.constant 0 : index
      %c0_13 = arith.constant 0 : index
      %c0_14 = arith.constant 0 : index
      %28 = vector.load %arg4[%c0_12, %c0_13, %c0_14] : memref<1x1x16xf32, #tpu.memory_space<vmem>>, vector<1x1x16xf32>
      tpu.vector_store %arg4[%c0_12, %c0_13, %c0_14], %27 {strides = array<i32>} : memref<1x1x16xf32, #tpu.memory_space<vmem>>, vector<1x1x16xf32>,
    } else {
    }
    return
  }
  func.func @transform_0(%arg0: i32, %arg1: i32) -> (i32, i32) {
    %c0_i32 = arith.constant 0 : i32
    %c0_i32_0 = arith.constant 0 : i32
    return %arg1, %c0_i32 : i32, i32
  }
  func.func @transform_1(%arg0: i32, %arg1: i32) -> (i32, i32) {
    %c0_i32 = arith.constant 0 : i32
    %c0_i32_0 = arith.constant 0 : i32
    return %c0_i32, %arg0 : i32, i32
  }
  func.func @transform_2(%arg0: i32, %arg1: i32) -> (i32, i32, i32) {
    %c0_i32 = arith.constant 0 : i32
    %c0_i32_0 = arith.constant 0 : i32
    %c0_i32_1 = arith.constant 0 : i32
    return %arg0, %c0_i32, %c0_i32_0 : i32, i32, i32
  }
}

</mosaic_0001>

<bundles_post_ra>
// kernel: tpu_custom_call.1
= control target key start
LH: loop header
LB: loop body
LE: loop exit
PB: predicated region body
PF: predicated region fallthrough
CT: control target
= control target key end

     0   :  { %7 = vsyncpa [#allocation4], 0  ;;  %s467_s9 = smov 0   ;;  %s469_s10 = smov 0   ;;  %s524_s0 = inlined_call_operand.vmem [shape: bf16[16,32], index: 0, kind: input, shape index: {}]   ;;  %s525_s1 = inlined_call_operand.vmem [shape: bf16[32,16], index: 1, kind: input, shape index: {}]   ;;  %s526_s2 = inlined_call_operand.hbm [shape: f32[1,1,16], index: 2, kind: output, shape index: {}]  }
   0x1   :  { %s471_s11 = smov 0  }
   0x2 LB: > { %s333_s12 = sadd.s32 4294967295, %s448_s11   ;;  %s22_s13 = sadd.s32 1, %s444_s10  ;;  %s448_s11 = sphi %s471_s11, %s13_s11   ;;  %s444_s10 = sphi %s469_s10, %s529_s10   ;;  %s440_s9 = sphi %s467_s9, %s528_s9  }
   0x3   : > { %p23_p0 = scmp.ge.s32.totalorder %s22_s13, 2  ;;  %p337_p1 = scmp.ge.s32.totalorder %s448_s11, 1 }
   0x4   : > { %p133_p2 = scmp.lt.s32.totalorder %s448_s11, 3 }
   0x5   : > { %s531_s13 = smov (%p23_p0, %s22_s13), 0 }
   0x6   : > { %p134_p3 = pnand %p337_p1, %p133_p2 }
   0x7   : > { %p153_p4 = scmp.lt.s32.totalorder (!%p134_p3), %s440_s9, 1  ;;  %p339_p5 = scmp.ne.s32.totalorder (!%p134_p3), %s440_s9, 0 }
   0x8   : > { %137 = sbr.rel (%p134_p3) target bundleno = 233 (0xe9), region = 28 }
   0xd   : > { %s154_s14 = scalar_select %p153_p4, %s440_s9, 1 }
   0xe   : > { %165 = sbr.rel (%p339_p5) target bundleno = 21 (0x15), region = 32 }
   0xf   : > { %s338_s15 = sshll.u32 %s154_s14, 2 }
  0x10   : > { %s156_s18 = scalar_lea.vmem %s524_s0, %s338_s15 }
  0x13   : > { %vm166_vm0 = vcmask 122880   ;;  %v450_v0 = vmov 0.0  }
  0x14   : > { %167 = vst.msk [vmem:[#allocation2] sm:$0x1] %vm166_vm0, %v450_v0 }
  0x15 PF: > { %v357_v1 = vld [vmem:[%s525_s1 + $0x8] sm:$0xff]  ;;  %v356_v2 = vld [vmem:[%s525_s1] sm:$0xff]  ;;  %vm185_vm1 = vcmask 261120   ;;  %s350_s23 = sshll.u32 %s440_s9, 3 }
  0x16   : > { %195 = vmatpush.bf16.msra.mxu0 %v357_v1  ;;  %v168_v3 = vld [vmem:[%s156_s18] sm:$0xf]  ;;  %s207_s24 = ssub.s32 0, %s350_s23 }
  0x17   : > { %p208_p6 = scmp.gt.s32.totalorder %s207_s24, 4294967280  ;;  %p209_p7 = scmp.lt.s32.totalorder %s207_s24, 8 }
  0x19   : > { %p501_p8 = pnand %p209_p7, %p208_p6 }
  0x1a   : > { %196 = vmatpush.bf16.msra.mxu0 %v356_v2 }
  0x1d   : > { %348 = vmatmul.msk.bf16.vlgmr.msra.gmra.mxu0 %vm185_vm1, %v168_v3 }
  0x9a   : > { %v198_v4 = vpop.f32.mrf.mxu0 }
  0x9b   : > { %v349_v5 = vadd.f32 -2.0, %v198_v4 }
  0x9d   : > { %v203_v6 = vmul.f32 1.442695, %v349_v5 }
  0x9f   : > { %390 = vpow2.f32 %v203_v6 }
  0xa1   : > { %213 = sbr.rel (%p501_p8) target bundleno = 190 (0xbe), region = 36 }
  0xa2   : > { %v200_v7 = vpop.f32.mrf.mxu0 }
  0xa5   : > { %v391_v8 = vpop.eup %390 }
  0xa6   : > { %v214_v9 = vlaneseq  ;;  %v218_v10 = vstv %s207_s24  ;;  %vm223_vm2 = vcmask 130048   ;;  %v222_v21 = vld [vmem:[#allocation2] sm:$0x1]  ;;  %vm232_vm4 = vcmask 122880  }
  0xa8   : > { %v215_v11 = vshrl.u32 %v214_v9, 7  ;;  %v217_v12 = vand.u32 127, %v214_v9 }
  0xaa   : > { %v219_v13 = vadd.s32 %v218_v10, %v217_v12 }
  0xac   : > { %vm220_vm3 = vcmp.eq.s32.totalorder %v215_v11, %v219_v13 }
  0xad   : > { %v221_v14 = vsel %vm220_vm3, 0.0, %v391_v8 }
  0xae   : > { %v224_v15 = vsel %vm223_vm2, %v221_v14, 0.0 }
  0xaf   : > { %v225_v16 = vrot.slane %v224_v15, 4 }
  0xb1   : > { %v226_v17 = vadd.f32 %v225_v16, %v224_v15 }
  0xb3   : > { %v227_v18 = vrot.slane %v226_v17, 2 }
  0xb5   : > { %v228_v19 = vadd.f32 %v227_v18, %v226_v17 }
  0xb7   : > { %v229_v20 = vrot.slane %v228_v19, 1 }
  0xb9   : > { %v230_v22 = vadd.f32 %v229_v20, %v228_v19 }
  0xbb   : > { %v231_v23 = vadd.f32 %v230_v22, %v222_v21 }
  0xbd   : > { %233 = vst.msk [vmem:[#allocation2] sm:$0x1] %vm232_vm4, %v231_v23 }
  0xbe PF: > { %236 = sbr.rel (!%p501_p8) target bundleno = 207 (0xcf), region = 40  ;;  %vm238_vm5 = vcmask (%p501_p8), 130048   ;;  %vm247_vm6 = vcmask (%p501_p8), 122880  }
  0xbf   : > { %v239_v24 = vsel (%p501_p8), %vm238_vm5, %v391_v8, 0.0 }
  0xc0   : > { %v240_v25 = vrot.slane (%p501_p8), %v239_v24, 4 }
  0xc2   : > { %v241_v26 = vadd.f32 (%p501_p8), %v240_v25, %v239_v24 }
  0xc4   : > { %v242_v27 = vrot.slane %v241_v26, 2  ;;  %v237_v30 = vld [vmem:[#allocation2] sm:$0x1] }
  0xc6   : > { %v243_v28 = vadd.f32 %v242_v27, %v241_v26 }
  0xc8   : > { %v244_v29 = vrot.slane %v243_v28, 1 }
  0xca   : > { %v245_v31 = vadd.f32 %v244_v29, %v243_v28 }
  0xcc   : > { %v246_v32 = vadd.f32 %v245_v31, %v237_v30 }
  0xce   : > { %248 = vst.msk [vmem:[#allocation2] sm:$0x1] %vm247_vm6, %v246_v32 }
  0xcf PF: > { %p351_p9 = scmp.ne.s32.totalorder %s440_s9, 1 }
  0xd1   : > { %252 = sbr.rel (%p351_p9) target bundleno = 227 (0xe3), region = 44 }
  0xd6   : > { %v253_v33 = vld [vmem:[#allocation2] sm:$0x1]  ;;  %vm257_vm7 = vcmask 122880  }
  0xd7   : > { %392 = vlog2.f32 %v253_v33 }
  0xdd   : > { %v393_v34 = vpop.eup %392 }
  0xde   : > { %v255_v35 = vmul.f32 0.6931472, %v393_v34 }
  0xe0   : > { %v256_v36 = vadd.f32 2.0, %v255_v35 }
  0xe2   : > { %258 = vst.msk [vmem:[#allocation3] sm:$0x1] %vm257_vm7, %v256_v36 }
  0xe3 PF: > { %p362_p10 = scmp.eq.s32.totalorder %s333_s12, 1  ;;  %s268_s28 = sshll.u32 %s526_s2, 4  ;;  %s269_s28 = int_to_ptr.hbm [resolvable:$true] %s268_s28 }
  0xe4   : > { %s451_s29 = smov [#allocation3]  }
  0xe5   : > { %s266_s30 = sshll.u32 %s451_s29, 4  ;;  %s267_s30 = int_to_ptr.vmem [resolvable:$true] %s266_s30 }
  0xe6   : > { %359 = dma.vmem_to_hbm [thread:$0]  (%p362_p10), %s267_s30, 16, %s269_s28, [#allocation4]  }
  0xe7   : > { %435 = dma.done.wait (%p362_p10), [#allocation4], 16  }
  0xe8   : > { %437 = vsyncadd (%p362_p10), [#allocation4], 4294967280 }
  0xe9 PF: > { %s13_s11 = sadd.s32 1, %s448_s11   ;;  %s528_s9 = smov %s444_s10 }
  0xea   : > { %p10_p11 = scmp.ge.s32.totalorder %s13_s11, 4   ;;  %s529_s10 = smov %s531_s13 }
  0xec   :  { %12 = sbr.rel (!%p10_p11) target bundleno = 2 (0x2), region = 75 }
  0xf1   :  { %282 = vsyncpa [#allocation4], 1 }
  0xf2   :  { %284 = vsyncpa [#allocation4 + $0x1], 1 }

</bundles_post_ra>
